<compile_context>
chip_gen: v7x
topology: tpu7x:2x2x1
jax: 0.10.0
libtpu: 0.0.40
codegen_flags: <defaults>
</compile_context>

<pallas_src>
import functools

import jax
import jax.numpy as jnp
from jax.experimental import pallas as pl
from jax.experimental.pallas import tpu as pltpu


# ----------------------------- fused kernel ---------------------------------

def fused_gcn_kernel(x_ref, k_ref, wc_ref, b_ref, o_ref, acc_ref, *, inv_pool):
    # x_ref  : (1, tp, VC_pad)  bf16  -- frame tile of one sample, (V*C) flattened+padded
    # k_ref  : (VC_pad, VCo)    bf16  -- kron(adjacency, conv weight), rows zero-padded
    # wc_ref : (VCo, ncls_pad)  f32   -- classifier tiled over graph nodes
    # b_ref  : (1, ncls_pad)    f32
    # o_ref  : (1, 1, ncls_pad) f32   -- logits for this sample
    # acc_ref: (8, VCo)         f32   -- running pooled sum (8 identical rows)
    k = pl.program_id(1)

    @pl.when(k == 0)
    def _init():
        acc_ref[...] = jnp.zeros_like(acc_ref)

    xb = x_ref[0]                                                      # (tp, VC_pad)
    # backbone block: graph aggregation + 1x1 conv as one MXU matmul, then ReLU.
    z = jnp.dot(xb, k_ref[...], preferred_element_type=jnp.float32)   # (tp, VCo)
    r = jnp.maximum(z, 0.0)
    # pooled-sum over the frame tile as a ones-matmul (kept on the MXU), f32 accumulate.
    ones = jnp.ones((8, xb.shape[0]), jnp.float32)
    acc_ref[...] += jnp.dot(ones, r, preferred_element_type=jnp.float32)

    @pl.when(k == pl.num_programs(1) - 1)
    def _finalize():
        # classifier (sum over graph nodes folded into wc_exp), then mean-scale + bias.
        logits8 = jnp.dot(acc_ref[...], wc_ref[...],
                          preferred_element_type=jnp.float32)          # (8, ncls_pad)
        o_ref[0] = (logits8[0:1] * inv_pool + b_ref[...]).astype(o_ref.dtype)


# ----------------------------- wrapper ---------------------------------------

def _round_up(x, m):
    return ((x + m - 1) // m) * m


def forward_test(keypoint, params, *, tp_target=1024):
    """BaseGCN.forward_test: cls_head(backbone(keypoint)) as one fused Pallas kernel."""
    N, M, T, V, C = keypoint.shape
    adj = params["adj"].astype(jnp.float32)          # (V, V)
    w_gcn = params["w_gcn"].astype(jnp.float32)      # (C, Cmid)
    w_cls = params["w_cls"].astype(jnp.float32)      # (Cmid, ncls)
    b_cls = params["b_cls"].reshape(1, -1).astype(jnp.float32)

    Cmid = w_gcn.shape[1]
    ncls = w_cls.shape[1]
    P = M * T
    VC = V * C
    VCo = V * Cmid
    VC_pad = _round_up(VC, 128)
    ncls_pad = _round_up(ncls, 128)

    # Fold adjacency + 1x1 conv:  z[p, w*Cmid+o] = sum_{v,c} x[p, v*C+c] * A[v,w] * W[c,o]
    k_mat = jnp.kron(adj, w_gcn)                                         # (VC, VCo)
    k_mat = jnp.pad(k_mat, ((0, VC_pad - VC), (0, 0))).astype(jnp.bfloat16)
    # Fold the sum over graph nodes into the classifier: wc_exp[w*Cmid+o, :] = Wc[o, :]
    wc_exp = jnp.pad(jnp.tile(w_cls, (V, 1)), ((0, 0), (0, ncls_pad - ncls)))
    bias = jnp.pad(b_cls, ((0, 0), (0, ncls_pad - ncls)))

    # (N, M, T, V, C) -> (N, P, V*C), bf16 storage, lane-pad channels, tile-pad frames.
    tp = min(tp_target, _round_up(P, 8))
    P_pad = _round_up(P, tp)
    x = keypoint.reshape(N, P, VC).astype(jnp.bfloat16)
    x = jnp.pad(x, ((0, 0), (0, P_pad - P), (0, VC_pad - VC)))
    kt = P_pad // tp
    inv_pool = 1.0 / float(P * V)

    kernel = functools.partial(fused_gcn_kernel, inv_pool=inv_pool)

    flops = 2 * N * P_pad * (VC_pad * VCo + 8 * VCo) + 2 * N * 8 * VCo * ncls_pad
    bytes_accessed = (x.size * 2 + k_mat.size * 2 + wc_exp.size * 4
                      + bias.size * 4 + N * ncls_pad * 4)

    logits = pl.pallas_call(
        kernel,
        out_shape=jax.ShapeDtypeStruct((N, 1, ncls_pad), jnp.float32),
        grid_spec=pltpu.PrefetchScalarGridSpec(
            num_scalar_prefetch=0,
            grid=(N, kt),                                   # frames axis = reduction
            in_specs=[
                pl.BlockSpec((1, tp, VC_pad), lambda n, k: (n, k, 0)),
                pl.BlockSpec((VC_pad, VCo), lambda n, k: (0, 0)),
                pl.BlockSpec((VCo, ncls_pad), lambda n, k: (0, 0)),
                pl.BlockSpec((1, ncls_pad), lambda n, k: (0, 0)),
            ],
            out_specs=pl.BlockSpec((1, 1, ncls_pad), lambda n, k: (n, 0, 0)),
            scratch_shapes=[pltpu.VMEM((8, VCo), jnp.float32)],
        ),
        compiler_params=pltpu.CompilerParams(
            dimension_semantics=("parallel", "arbitrary"),
            vmem_limit_bytes=32 * 1024 * 1024,
        ),
        cost_estimate=pl.CostEstimate(
            flops=flops, transcendentals=0, bytes_accessed=bytes_accessed),
    )(x, k_mat, wc_exp, bias)

    return logits[:, 0, :ncls]


def forward(keypoint, params, label=None, return_loss=False):
    """Mirrors BaseGCN.forward dispatch."""
    if return_loss:
        if label is None:
            raise ValueError("Label should not be None.")
        # TODO(synk): forward_train / _parse_losses (host-side loss dict aggregation and
        # torch.distributed all_reduce) have no Pallas equivalent; inference path only.
        raise NotImplementedError("training path not implemented")
    return forward_test(keypoint, params)


# ----------------------------- reference & params ----------------------------

def forward_test_reference(keypoint, params):
    """Pure-JAX unfused reference (same bf16-quantized input as the kernel path)."""
    N, M, T, V, C = keypoint.shape
    x = keypoint.astype(jnp.bfloat16).astype(jnp.float32).reshape(N * M * T, V, C)
    y = jnp.einsum("vw,bvc->bwc", params["adj"].astype(jnp.float32), x)
    z = jnp.maximum(jnp.einsum("bwc,co->bwo", y, params["w_gcn"].astype(jnp.float32)), 0.0)
    feat = z.reshape(N, M * T * V, -1)
    pooled = feat.mean(axis=1)
    return pooled @ params["w_cls"].astype(jnp.float32) + params["b_cls"].reshape(1, -1)


def build_adjacency(V):
    """Deterministic degree-normalized ring adjacency with self loops."""
    idx = jnp.arange(V)
    a = jnp.zeros((V, V), jnp.float32)
    a = a.at[idx, idx].set(1.0)
    a = a.at[idx, (idx + 1) % V].set(1.0)
    a = a.at[(idx + 1) % V, idx].set(1.0)
    deg = a.sum(axis=1, keepdims=True)
    return a / deg


if __name__ == "__main__":
    key = jax.random.PRNGKey(0)
    k_kp, k_w, k_cls = jax.random.split(key, 3)

    # keypoint layout (mmaction2 skeleton pipeline): (N, M, T, V, C)
    N, M, T, V, C = 2, 2, 8, 16, 4
    Cmid, num_classes = 16, 8

    keypoint = jax.random.normal(k_kp, (N, M, T, V, C), jnp.float32)
    params = dict(
        adj=build_adjacency(V),
        w_gcn=jax.random.normal(k_w, (C, Cmid), jnp.float32) * 0.1,
        w_cls=jax.random.normal(k_cls, (Cmid, num_classes), jnp.float32) * 0.1,
        b_cls=jnp.zeros((1, num_classes), jnp.float32),
    )

    scores = forward(keypoint, params, return_loss=False)
    jax.block_until_ready(scores)
    assert scores.shape == (N, num_classes)

    ref = forward_test_reference(keypoint, params)
    max_diff = float(jnp.max(jnp.abs(scores - ref)))
    assert jnp.allclose(scores, ref, rtol=5e-2, atol=2e-2), f"max abs diff {max_diff}"
    print("KERNEL_OK")
</pallas_src>

<mosaic_0001>
module attributes {stable_mosaic.version = 11 : i64} {
  func.func @fused_gcn_kernel(%arg0: i32, %arg1: i32, %arg2: memref<1x16x128xbf16, #tpu.memory_space<vmem>>, %arg3: memref<128x256xbf16, #tpu.memory_space<vmem>>, %arg4: memref<256x128xf32, #tpu.memory_space<vmem>>, %arg5: memref<1x128xf32, #tpu.memory_space<vmem>>, %arg6: memref<1x1x128xf32, #tpu.memory_space<vmem>>, %arg7: memref<8x256xf32, #tpu.memory_space<vmem>>) attributes {dimension_semantics = [#tpu.dimension_semantics<parallel>, #tpu.dimension_semantics<arbitrary>], iteration_bounds = array<i64: 2, 1>, scalar_prefetch = 0 : i64, scratch_operands = 1 : i64, tpu.core_type = #tpu.core_type<tc>, window_params = [{transform_indices = @transform_0, window_bounds = array<i64: 1, 16, 128>}, {pipeline_mode = #tpu.pipeline_mode<synchronous>, transform_indices = @transform_1, window_bounds = array<i64: 128, 256>}, {pipeline_mode = #tpu.pipeline_mode<synchronous>, transform_indices = @transform_2, window_bounds = array<i64: 256, 128>}, {pipeline_mode = #tpu.pipeline_mode<synchronous>, transform_indices = @transform_3, window_bounds = array<i64: 1, 128>}, {transform_indices = @transform_4, window_bounds = array<i64: 1, 1, 128>}]} {
    %c0_i32 = arith.constant 0 : i32
    %0 = arith.cmpi eq, %arg1, %c0_i32 : i32
    %1 = arith.extui %0 : i1 to i32
    %c0_i32_0 = arith.constant 0 : i32
    %2 = arith.cmpi ne, %1, %c0_i32_0 : i32
    scf.if %2 {
      %cst_14 = arith.constant 0.000000e+00 : f32
      %17 = vector.broadcast %cst_14 : f32 to vector<8x256xf32>
      %c0_15 = arith.constant 0 : index
      %c0_16 = arith.constant 0 : index
      %18 = vector.load %arg7[%c0_15, %c0_16] : memref<8x256xf32, #tpu.memory_space<vmem>>, vector<8x256xf32>
      tpu.vector_store %arg7[%c0_15, %c0_16], %17 {strides = array<i32>} : memref<8x256xf32, #tpu.memory_space<vmem>>, vector<8x256xf32>,
    } else {
    }
    %c0 = arith.constant 0 : index
    %c0_1 = arith.constant 0 : index
    %c0_2 = arith.constant 0 : index
    %3 = vector.load %arg2[%c0, %c0_1, %c0_2] : memref<1x16x128xbf16, #tpu.memory_space<vmem>>, vector<1x16x128xbf16>
    %4 = vector.shape_cast %3 : vector<1x16x128xbf16> to vector<16x128xbf16>
    %c0_3 = arith.constant 0 : index
    %c0_4 = arith.constant 0 : index
    %5 = vector.load %arg3[%c0_3, %c0_4] : memref<128x256xbf16, #tpu.memory_space<vmem>>, vector<128x256xbf16>
    %cst = arith.constant dense<0.000000e+00> : vector<16x256xf32>
    %6 = tpu.matmul %4, %5, %cst {dimension_numbers = #tpu.dot_dimension_numbers<[1], [0], [0], [1], [0, 0, 1, 1], [], []>} : vector<16x128xbf16>, vector<128x256xbf16>, vector<16x256xf32> -> vector<16x256xf32>
    %cst_5 = arith.constant 0.000000e+00 : f32
    %7 = vector.broadcast %cst_5 : f32 to vector<16x256xf32>
    %8 = arith.maximumf %6, %7 : vector<16x256xf32>
    %cst_6 = arith.constant 1.000000e+00 : f32
    %9 = vector.broadcast %cst_6 : f32 to vector<8x16xf32>
    %c0_7 = arith.constant 0 : index
    %c0_8 = arith.constant 0 : index
    %10 = vector.load %arg7[%c0_7, %c0_8] : memref<8x256xf32, #tpu.memory_space<vmem>>, vector<8x256xf32>
    %cst_9 = arith.constant dense<0.000000e+00> : vector<8x256xf32>
    %11 = tpu.matmul %9, %8, %cst_9 {dimension_numbers = #tpu.dot_dimension_numbers<[1], [0], [0], [1], [0, 0, 1, 1], [], []>} : vector<8x16xf32>, vector<16x256xf32>, vector<8x256xf32> -> vector<8x256xf32>
    %12 = arith.addf %10, %11 : vector<8x256xf32>
    %c0_10 = arith.constant 0 : index
    %c0_11 = arith.constant 0 : index
    %13 = vector.load %arg7[%c0_10, %c0_11] : memref<8x256xf32, #tpu.memory_space<vmem>>, vector<8x256xf32>
    tpu.vector_store %arg7[%c0_10, %c0_11], %12 {strides = array<i32>} : memref<8x256xf32, #tpu.memory_space<vmem>>, vector<8x256xf32>,
    %c0_i32_12 = arith.constant 0 : i32
    %14 = arith.cmpi eq, %arg1, %c0_i32_12 : i32
    %15 = arith.extui %14 : i1 to i32
    %c0_i32_13 = arith.constant 0 : i32
    %16 = arith.cmpi ne, %15, %c0_i32_13 : i32
    scf.if %16 {
      %c0_14 = arith.constant 0 : index
      %c0_15 = arith.constant 0 : index
      %17 = vector.load %arg7[%c0_14, %c0_15] : memref<8x256xf32, #tpu.memory_space<vmem>>, vector<8x256xf32>
      %c0_16 = arith.constant 0 : index
      %c0_17 = arith.constant 0 : index
      %18 = vector.load %arg4[%c0_16, %c0_17] : memref<256x128xf32, #tpu.memory_space<vmem>>, vector<256x128xf32>
      %cst_18 = arith.constant dense<0.000000e+00> : vector<8x128xf32>
      %19 = tpu.matmul %17, %18, %cst_18 {dimension_numbers = #tpu.dot_dimension_numbers<[1], [0], [0], [1], [0, 0, 1, 1], [], []>} : vector<8x256xf32>, vector<256x128xf32>, vector<8x128xf32> -> vector<8x128xf32>
      %20 = vector.extract_strided_slice %19 {offsets = [0, 0], sizes = [1, 128], strides = [1, 1]} : vector<8x128xf32> to vector<1x128xf32>
      %cst_19 = arith.constant 3.906250e-03 : f32
      %21 = vector.broadcast %cst_19 : f32 to vector<1x128xf32>
      %22 = arith.mulf %20, %21 : vector<1x128xf32>
      %c0_20 = arith.constant 0 : index
      %c0_21 = arith.constant 0 : index
      %23 = vector.load %arg5[%c0_20, %c0_21] : memref<1x128xf32, #tpu.memory_space<vmem>>, vector<1x128xf32>
      %24 = arith.addf %22, %23 : vector<1x128xf32>
      %c0_22 = arith.constant 0 : index
      %c0_23 = arith.constant 0 : index
      %c0_24 = arith.constant 0 : index
      %25 = vector.load %arg6[%c0_22, %c0_23, %c0_24] : memref<1x1x128xf32, #tpu.memory_space<vmem>>, vector<1x1x128xf32>
      %26 = vector.shape_cast %25 : vector<1x1x128xf32> to vector<1x128xf32>
      %27 = vector.shape_cast %24 : vector<1x128xf32> to vector<1x1x128xf32>
      tpu.vector_store %arg6[%c0_22, %c0_23, %c0_24], %27 {strides = array<i32>} : memref<1x1x128xf32, #tpu.memory_space<vmem>>, vector<1x1x128xf32>,
    } else {
    }
    return
  }
  func.func @transform_0(%arg0: i32, %arg1: i32) -> (i32, i32, i32) {
    %c0_i32 = arith.constant 0 : i32
    %c0_i32_0 = arith.constant 0 : i32
    return %arg0, %arg1, %c0_i32 : i32, i32, i32
  }
  func.func @transform_1(%arg0: i32, %arg1: i32) -> (i32, i32) {
    %c0_i32 = arith.constant 0 : i32
    %c0_i32_0 = arith.constant 0 : i32
    %c0_i32_1 = arith.constant 0 : i32
    return %c0_i32, %c0_i32_0 : i32, i32
  }
  func.func @transform_2(%arg0: i32, %arg1: i32) -> (i32, i32) {
    %c0_i32 = arith.constant 0 : i32
    %c0_i32_0 = arith.constant 0 : i32
    %c0_i32_1 = arith.constant 0 : i32
    return %c0_i32, %c0_i32_0 : i32, i32
  }
  func.func @transform_3(%arg0: i32, %arg1: i32) -> (i32, i32) {
    %c0_i32 = arith.constant 0 : i32
    %c0_i32_0 = arith.constant 0 : i32
    %c0_i32_1 = arith.constant 0 : i32
    return %c0_i32, %c0_i32_0 : i32, i32
  }
  func.func @transform_4(%arg0: i32, %arg1: i32) -> (i32, i32, i32) {
    %c0_i32 = arith.constant 0 : i32
    %c0_i32_0 = arith.constant 0 : i32
    %c0_i32_1 = arith.constant 0 : i32
    return %arg0, %c0_i32, %c0_i32_0 : i32, i32, i32
  }
}

</mosaic_0001>

<bundles_post_ra>
// kernel: tpu_custom_call.1
= control target key start
LH: loop header
LB: loop body
LE: loop exit
PB: predicated region body
PF: predicated region fallthrough
CT: control target
= control target key end

     0   :  { %9 = vsyncpa [#allocation4], 0  ;;  %s1411_s0 = inlined_call_operand.hbm [shape: bf16[2,16,128], index: 0, kind: input, shape index: {}]   ;;  %s1412_s1 = inlined_call_operand.hbm [shape: bf16[128,256], index: 1, kind: input, shape index: {}]   ;;  %s1413_s2 = inlined_call_operand.hbm [shape: f32[256,128], index: 2, kind: input, shape index: {}]   ;;  %s1414_s3 = inlined_call_operand.vmem [shape: f32[1,128], index: 3, kind: input, shape index: {}]   ;;  %s1415_s4 = inlined_call_operand.hbm [shape: f32[2,1,128], index: 4, kind: output, shape index: {}]  }
   0x1   :  { %11 = vsyncpa [#allocation4 + $0x1], 0 }
   0x2   :  { %12 = vsyncpa [#allocation7], 0 }
   0x3   :  { %13 = vsyncpa [#allocation5], 0 }
   0x4   :  { %15 = vsyncpa [#allocation5 + $0x1], 0  ;;  %s1151_s15 = smov 0   ;;  %s1153_s16 = smov 0  }
   0x5   :  { %s1155_s17 = smov 0   ;;  %s1157_s18 = smov 0  }
   0x6   :  { %s1159_s19 = smov 0   ;;  %s1161_s20 = smov 0  }
   0x7 LB: > { %s720_s21 = sadd.s32 4294967295, %s1113_s20   ;;  %s721_s22 = sadd.s32 4294967294, %s1113_s20   ;;  %s1113_s20 = sphi %s1161_s20, %s21_s20   ;;  %s1109_s19 = sphi %s1159_s19, %s1437_s19   ;;  %s1105_s18 = sphi %s1157_s18, %s1436_s18   ;;  %s1101_s17 = sphi %s1155_s17, %s1435_s17   ;;  %s1097_s16 = sphi %s1153_s16, %s1434_s16   ;;  %s1093_s15 = sphi %s1151_s15, %s1433_s15  }
   0x8   : > { %p55_p0 = scmp.ne.s32.totalorder %s1097_s16, %s1093_s15  ;;  %p1185_p1 = scmp.eq.s32.totalorder %s720_s21, 0 }
   0x9   : > { %p1189_p2 = scmp.eq.s32.totalorder %s720_s21, 1  ;;  %p148_p3 = scmp.eq.s32.totalorder %s721_s22, 1 }
   0xa   : > { %s1420_s23 = scalar_select %p1185_p1, 1, 0 }
   0xb   : > { %p1195_p4 = por %p1185_p1, %p55_p0  ;;  %p722_p5 = scmp.ge.s32.totalorder %s1113_s20, 1 }
   0xc   : > { %p1200_p6 = por %p148_p3, %p55_p0  ;;  %p155_p7 = scmp.lt.s32.totalorder %s1113_s20, 3 }
   0xd   : > { %s1422_s25 = scalar_select %p1195_p4, 1, 0 }
   0xe   : > { %s1423_s26 = scalar_select %p1200_p6, 1, 0 }
   0xf   : > { %p1205_p8 = pnand %p722_p5, %p155_p7  ;;  %s1115_s28 = smov [#allocation6]  }
  0x10   : > { %s167_s29 = sshll.u32 %s1115_s28, 4  ;;  %s1116_s5 = smov [#allocation8]   ;;  %s1209_s29 = int_to_ptr.vmem [resolvable:$true] %s167_s29 }
  0x11   : > { %p838_p9 = pneg %p1205_p8  ;;  %s180_s6 = sshll.u32 %s1116_s5, 4  ;;  %s1220_s6 = int_to_ptr.vmem [resolvable:$true] %s180_s6 }
  0x12   : > { %s941_s9 = scalar_lea.hbm %s1412_s1, 2048 }
  0x13   : > { %p1216_p11 = pnand %p838_p9, %p1185_p1  ;;  %p942_p12 = scmp.ne.s32.totalorder %s1412_s1, %s941_s9 }
  0x14   : > { %p948_p5 = scmp.lt.u32.totalorder %s941_s9, %s1412_s1 }
  0x15   : > { %p943_p13 = pneg %p1216_p11 }
  0x17   : > { %p944_p0 = pnand %p943_p13, %p942_p12 }
  0x19   : > { %p945_p3 = pneg %p944_p0 }
  0x1b   : > { %p950_p7 = pnand %p948_p5, %p945_p3 }
  0x1d   : > { %953 = shalt.err (!%p950_p7)
}
  0x1e   : > { %s954_s14 = scalar_lea.vmem %s1209_s29, 2048  ;;  %p962_p1 = scmp.lt.s32.totalorder %s1209_s29, %s1209_s29 }
  0x1f   : > { %p955_p9 = scmp.ne.s32.totalorder %s1209_s29, %s954_s14  ;;  %p963_p12 = scmp.lt.s32.totalorder %s954_s14, %s954_s14 }
  0x21   : > { %p957_p10 = pnand %p955_p9, %p943_p13  ;;  %p964_p0 = por %p963_p12, %p962_p1 }
  0x23   : > { %p958_p6 = pneg %p957_p10 }
  0x25   : > { %p965_p4 = pnand %p964_p0, %p958_p6 }
  0x27   : > { %968 = shalt.err (!%p965_p4)
}
  0x28   : > { %s1117_s21 = smov 128   ;;  %s1118_s22 = smov 8  }
  0x29   : > { %841 = dma.hbm_to_vmem [thread:$0]  (!%p1216_p11), %s1412_s1, 2048, %s1209_s29, [#allocation7], %s1117_s21, %s1117_s21, %s1118_s22  }
  0x2a   : > { %s969_s9 = scalar_lea.hbm %s1413_s2, 4096 }
  0x2b   : > { %p970_p1 = scmp.ne.s32.totalorder %s1413_s2, %s969_s9  ;;  %p976_p10 = scmp.lt.u32.totalorder %s969_s9, %s1413_s2 }
  0x2d   : > { %p972_p4 = pnand %p970_p1, %p943_p13 }
  0x2f   : > { %p973_p6 = pneg %p972_p4 }
  0x31   : > { %p978_p3 = pnand %p976_p10, %p973_p6 }
  0x33   : > { %981 = shalt.err (!%p978_p3)
}
  0x34   : > { %s982_s29 = scalar_lea.vmem %s1220_s6, 4096  ;;  %p990_p12 = scmp.lt.s32.totalorder %s1220_s6, %s1220_s6 }
  0x35   : > { %p983_p5 = scmp.ne.s32.totalorder %s1220_s6, %s982_s29  ;;  %p991_p0 = scmp.lt.s32.totalorder %s982_s29, %s982_s29 }
  0x37   : > { %p985_p7 = pnand %p983_p5, %p943_p13  ;;  %p992_p1 = por %p991_p0, %p990_p12 }
  0x39   : > { %p986_p9 = pneg %p985_p7 }
  0x3b   : > { %p993_p4 = pnand %p992_p1, %p986_p9 }
  0x3d   : > { %996 = shalt.err (!%p993_p4)
}
  0x3e   : > { %844 = dma.hbm_to_vmem [thread:$0]  (!%p1216_p11), %s1413_s2, 4096, %s1220_s6, [#allocation7], %s1117_s21, %s1117_s21, %s1118_s22  }
  0x3f   : > { %s33_s5 = sadd.s32 1, %s1109_s19  ;;  %s42_s7 = sadd.s32 1, %s1101_s17 }
  0x40   : > { %p35_p13 = scmp.ge.s32.totalorder %s33_s5, 2  ;;  %p49_p6 = scmp.ne.s32.totalorder %s1101_s17, %s1097_s16 }
  0x41   : > { %p50_p10 = scmp.eq.s32.totalorder %s1113_s20, 0  ;;  %p855_p3 = scmp.lt.s32.totalorder %s1113_s20, 2 }
  0x42   : > { %s1439_s5 = smov (%p35_p13, %s33_s5), 0  ;;  %p1284_p7 = por %p1189_p2, %p49_p6 }
  0x43   : > { %p51_p5 = por %p50_p10, %p49_p6  ;;  %s37_s8 = ssub.s32 %s1109_s19, %s1439_s5 }
  0x44   : > { %s1426_s30 = scalar_select %p1284_p7, 1, 0 }
  0x45   : > { %s197_s9 = sand.u32 1, %s1101_s17   ;;  %p40_p9 = scmp.eq.s32.totalorder %s37_s8, 0 }
  0x46   : > { %s726_s6 = sshll.u32 %s197_s9, 3  ;;  %s754_s21 = sshll.u32 %s1109_s19, 7 }
  0x47   : > { %s1293_s22 = scalar_select %p40_p9, %s1101_s17, %s42_s7  }
  0x48   : > { %s1298_s12 = scalar_lea.hbm %s1411_s0, %s754_s21  ;;  %s201_s24 = scalar_lea.vmem [#allocation3], %s726_s6 }
  0x49   : > { %s210_s13 = sshll.u32 %s201_s24, 4  ;;  %p1302_p2 = pnand %p855_p3, %p51_p5  ;;  %s1306_s13 = int_to_ptr.vmem [resolvable:$true] %s210_s13 }
  0x4a   : > { %s1308_s14 = scalar_lea.sflag [#allocation4], %s197_s9  ;;  %s997_s28 = scalar_lea.hbm %s1298_s12, 128 }
  0x4b   : > { %p998_p11 = scmp.ne.s32.totalorder %s1298_s12, %s997_s28  ;;  %p999_p12 = pneg %p1302_p2 }
  0x4c   : > { %s1002_s6 = scalar_lea.hbm %s1411_s0, 256  ;;  %p1003_p4 = scmp.lt.u32.totalorder %s1298_s12, %s1411_s0 }
  0x4d   : > { %p1000_p0 = pnand %p999_p12, %p998_p11  ;;  %p1004_p13 = scmp.lt.u32.totalorder %s1002_s6, %s997_s28 }
  0x4e   : > { %p1006_p10 = scmp.lt.u32.totalorder %s997_s28, %s1298_s12 }
  0x4f   : > { %p1001_p1 = pneg %p1000_p0  ;;  %p1005_p6 = por %p1004_p13, %p1003_p4 }
  0x51   : > { %p1007_p3 = por %p1006_p10, %p1005_p6 }
  0x53   : > { %p1008_p5 = pnand %p1007_p3, %p1001_p1 }
  0x55   : > { %1011 = shalt.err (!%p1008_p5)
}
  0x56   : > { %s1012_s9 = scalar_lea.vmem %s1306_s13, 128  ;;  %s1119_s11 = smov [#allocation3]  }
  0x57   : > { %p1013_p9 = scmp.ne.s32.totalorder %s1306_s13, %s1012_s9  ;;  %s1017_s24 = sshll.u32 %s1119_s11, 4  ;;  %s1018_s24 = int_to_ptr.vmem [resolvable:$false] %s1017_s24 }
  0x58   : > { %s1019_s7 = scalar_lea.vmem %s1018_s24, 256  ;;  %p1020_p7 = scmp.lt.s32.totalorder %s1306_s13, %s1018_s24 }
  0x59   : > { %p1015_p11 = pnand %p1013_p9, %p999_p12  ;;  %p1021_p4 = scmp.lt.s32.totalorder %s1019_s7, %s1012_s9 }
  0x5b   : > { %p1016_p0 = pneg %p1015_p11  ;;  %p1022_p13 = por %p1021_p4, %p1020_p7 }
  0x5d   : > { %p1023_p6 = pnand %p1022_p13, %p1016_p0 }
  0x5f   : > { %1026 = shalt.err (!%p1023_p6)
}
  0x60   : > { %s1120_s28 = smov 64   ;;  %s1121_s8 = smov 4  }
  0x61   : > { %848 = dma.hbm_to_vmem [thread:$0]  (!%p1302_p2), %s1298_s12, 128, %s1306_s13, %s1308_s14, %s1120_s28, %s1120_s28, %s1121_s8  }
  0x62   : > { %222 = sbr.rel (%p1205_p8) target bundleno = 812 (0x32c), region = 36  ;;  %s1339_s6 = sand.u32 (!%p1205_p8), 1, %s1097_s16  }
  0x63   : > { %s730_s21 = sshll.u32 (!%p1205_p8), %s1339_s6, 3  ;;  %s225_s10 = scalar_lea.sflag (!%p1205_p8), [#allocation4], %s1339_s6 }
  0x64   : > { %s1343_s9 = scalar_lea.vmem (!%p1205_p8), [#allocation3], %s730_s21  ;;  %p1428_p7 = scmp.ne.s32.totalorder (!%p1205_p8), %s1422_s25, 0 }
  0x69   : > { %1080 = dma.done.wait (%p1428_p7), %s225_s10, 128  }
  0x6a   : > { %1082 = vsyncadd (%p1428_p7), %s225_s10, 4294967168  ;;  %p1429_p2 = scmp.ne.s32.totalorder %s1420_s23, 0 }
  0x6c   : > { %1084 = dma.done.wait (%p1429_p2), [#allocation7], 6144  }
  0x6d   : > { %1086 = vsyncadd (%p1429_p2), [#allocation7], 4294961152  ;;  %v1122_v0 = vmov 0   ;;  %v916_v1 = vld [vmem:[#allocation6 + $0x4] ss:$8 sps:$4 sm:$0xff]   ;;  %v940_v17 = vld [vmem:[%s1343_s9] sm:$0xff]  }
  0x6e   : > { %404 = vmatprep.mubr.bf16.mxu0 %v1122_v0  ;;  %v918_v2 = vld [vmem:[#allocation6] ss:$8 sps:$4 sm:$0xff]   ;;  %372 = vmatprep.subr.bf16.mxu0 %v916_v1  ;;  %v919_v3 = vld [vmem:[#allocation6 + $0x14] ss:$8 sps:$4 sm:$0xff]   ;;  %v921_v4 = vld [vmem:[#allocation6 + $0x10] ss:$8 sps:$4 sm:$0xff]  }
  0x6f   : > { %373 = vmatpush1.bf16.msra.mxu0 %v918_v2  ;;  %v922_v5 = vld [vmem:[#allocation6 + $0x24] ss:$8 sps:$4 sm:$0xff]   ;;  %v924_v6 = vld [vmem:[#allocation6 + $0x20] ss:$8 sps:$4 sm:$0xff]   ;;  %v925_v7 = vld [vmem:[#allocation6 + $0x34] ss:$8 sps:$4 sm:$0xff]  }
  0x70   : > { %374 = vmatprep.subr.bf16.mxu0 %v919_v3  ;;  %v927_v8 = vld [vmem:[#allocation6 + $0x30] ss:$8 sps:$4 sm:$0xff]   ;;  %v928_v9 = vld [vmem:[#allocation6 + $0x44] ss:$8 sps:$4 sm:$0xff]   ;;  %v930_v10 = vld [vmem:[#allocation6 + $0x40] ss:$8 sps:$4 sm:$0xff]  }
  0x71   : > { %v931_v11 = vld [vmem:[#allocation6 + $0x54] ss:$8 sps:$4 sm:$0xff]   ;;  %v933_v12 = vld [vmem:[#allocation6 + $0x50] ss:$8 sps:$4 sm:$0xff]   ;;  %v934_v13 = vld [vmem:[#allocation6 + $0x64] ss:$8 sps:$4 sm:$0xff]  }
  0x72   : > { %v936_v14 = vld [vmem:[#allocation6 + $0x60] ss:$8 sps:$4 sm:$0xff]   ;;  %v937_v15 = vld [vmem:[#allocation6 + $0x74] ss:$8 sps:$4 sm:$0xff]   ;;  %v939_v16 = vld [vmem:[#allocation6 + $0x70] ss:$8 sps:$4 sm:$0xff]  }
  0x73   : > { %375 = vmatpush1.bf16.msra.mxu0 %v921_v4  ;;  %v1123_v18 = vmov 0.0   ;;  %v521_v25 = vld [vmem:[#allocation8 + $0x80] sm:$0xff]  ;;  %v522_v26 = vld [vmem:[#allocation8 + $0x88] sm:$0xff]  ;;  %v523_v34 = vld [vmem:[#allocation8 + $0x90] sm:$0xff]  ;;  %vm421_vm0 = vcmask 130048   ;;  %v1124_v42 = vmov 1.0  }
  0x74   : > { %376 = vmatprep.subr.bf16.mxu0 %v922_v5  ;;  %489 = vmatprep.mubr.f32.mxu1 %v1123_v18  ;;  %v794_v31 = vpack.c.bf16 %v522_v26, %v521_v25  ;;  %v505_v32 = vld [vmem:[#allocation8] sm:$0xff]  ;;  %v506_v33 = vld [vmem:[#allocation8 + $0x8] sm:$0xff]  ;;  %v524_v35 = vld [vmem:[#allocation8 + $0x98] sm:$0xff]  ;;  %s751_s27 = sshll.u32 %s1105_s18, 4  ;;  %s259_s12 = scalar_lea.vmem [#allocation9], %s1339_s6 }
  0x75   : > { %v796_v36 = vpack.c.bf16 %v506_v33, %v505_v32  ;;  %v798_v37 = vpack.c.bf16 %v524_v35, %v523_v34  ;;  %v507_v38 = vld [vmem:[#allocation8 + $0x10] sm:$0xff]  ;;  %v508_v39 = vld [vmem:[#allocation8 + $0x18] sm:$0xff]  ;;  %v525_v40 = vld [vmem:[#allocation8 + $0xa0] sm:$0xff]  ;;  %s624_s13 = sshll.u32 %s259_s12, 4  ;;  %s1362_s11 = scalar_lea.hbm %s1415_s4, %s751_s27  ;;  %s1364_s13 = int_to_ptr.vmem [resolvable:$true] %s624_s13 }
  0x76   : > { %v526_v41 = vld [vmem:[#allocation8 + $0xa8] sm:$0xff]  ;;  %v800_v43 = vpack.c.bf16 %v508_v39, %v507_v38  ;;  %v509_v45 = vld [vmem:[#allocation8 + $0x20] sm:$0xff]  ;;  %v527_v47 = vld [vmem:[#allocation8 + $0xb0] sm:$0xff]  ;;  %s612_s24 = scalar_lea.sflag [#allocation5], %s1339_s6  ;;  %s1027_s7 = scalar_lea.vmem %s1364_s13, 16 }
  0x77   : > { %377 = vmatpush1.bf16.msra.mxu0 %v924_v6  ;;  %v802_v44 = vpack.c.bf16 %v526_v41, %v525_v40  ;;  %v510_v46 = vld [vmem:[#allocation8 + $0x28] sm:$0xff]  ;;  %v528_v48 = vld [vmem:[#allocation8 + $0xb8] sm:$0xff]  ;;  %v511_v51 = vld [vmem:[#allocation8 + $0x30] sm:$0xff]  ;;  %p1028_p8 = scmp.ne.s32.totalorder %s1364_s13, %s1027_s7  ;;  %p1430_p12 = scmp.ne.s32.totalorder %s1426_s30, 0 }
  0x78   : > { %378 = vmatprep.subr.bf16.mxu0 %v925_v7  ;;  %v804_v49 = vpack.c.bf16 %v510_v46, %v509_v45  ;;  %v806_v50 = vpack.c.bf16 %v528_v48, %v527_v47  ;;  %v512_v52 = vld [vmem:[#allocation8 + $0x38] sm:$0xff]  ;;  %v529_v53 = vld [vmem:[#allocation8 + $0xc0] sm:$0xff]  ;;  %v530_v54 = vld [vmem:[#allocation8 + $0xc8] sm:$0xff]  ;;  %s1125_s18 = smov [#allocation9]  }
  0x79   : > { %v808_v55 = vpack.c.bf16 %v512_v52, %v511_v51  ;;  %v810_v56 = vpack.c.bf16 %v530_v54, %v529_v53  ;;  %v513_v57 = vld [vmem:[#allocation8 + $0x40] sm:$0xff]  ;;  %v514_v58 = vld [vmem:[#allocation8 + $0x48] sm:$0xff]  ;;  %v531_v59 = vld [vmem:[#allocation8 + $0xd0] sm:$0xff]  ;;  %p1029_p1 = pnand %p1028_p8, %p1430_p12  ;;  %s1031_s28 = sshll.u32 %s1125_s18, 4  ;;  %s1032_s28 = int_to_ptr.vmem [resolvable:$false] %s1031_s28 }
  0x7a   : > { %v532_v60 = vld [vmem:[#allocation8 + $0xd8] sm:$0xff]  ;;  %v812_v61 = vpack.c.bf16 %v514_v58, %v513_v57  ;;  %v515_v63 = vld [vmem:[#allocation8 + $0x50] sm:$0xff]  ;;  %v533_v1 = vld [vmem:[#allocation8 + $0xe0] sm:$0xff]  ;;  %s1033_s8 = scalar_lea.vmem %s1032_s28, 32  ;;  %p1034_p3 = scmp.lt.s32.totalorder %s1364_s13, %s1032_s28 }
  0x7b   : > { %379 = vmatpush1.bf16.msra.mxu0 %v927_v8  ;;  %v814_v62 = vpack.c.bf16 %v532_v60, %v531_v59  ;;  %v516_v0 = vld [vmem:[#allocation8 + $0x58] sm:$0xff]  ;;  %v534_v2 = vld [vmem:[#allocation8 + $0xe8] sm:$0xff]  ;;  %v517_v5 = vld [vmem:[#allocation8 + $0x60] sm:$0xff]  ;;  %p1030_p10 = pneg %p1029_p1  ;;  %p1035_p5 = scmp.lt.s32.totalorder %s1033_s8, %s1027_s7 }
  0x7c   : > { %380 = vmatprep.subr.bf16.mxu0 %v928_v9  ;;  %v816_v3 = vpack.c.bf16 %v516_v0, %v515_v63  ;;  %v818_v4 = vpack.c.bf16 %v534_v2, %v533_v1  ;;  %v518_v6 = vld [vmem:[#allocation8 + $0x68] sm:$0xff]  ;;  %v535_v7 = vld [vmem:[#allocation8 + $0xf0] sm:$0xff]  ;;  %v536_v8 = vld [vmem:[#allocation8 + $0xf8] sm:$0xff] }
  0x7d   : > { %v820_v9 = vpack.c.bf16 %v518_v6, %v517_v5  ;;  %p1036_p9 = por %p1035_p5, %p1034_p3 }
  0x7f   : > { %381 = vmatpush1.bf16.msra.mxu0 %v930_v10  ;;  %v822_v10 = vpack.c.bf16 %v536_v8, %v535_v7  ;;  %p1037_p11 = pnand %p1036_p9, %p1030_p10 }
  0x80   : > { %382 = vmatprep.subr.bf16.mxu0 %v931_v11  ;;  %v519_v11 = vld [vmem:[#allocation8 + $0x70] sm:$0xff] }
  0x83   : > { %383 = vmatpush1.bf16.msra.mxu0 %v933_v12  ;;  %v520_v12 = vld [vmem:[#allocation8 + $0x78] sm:$0xff] }
  0x84   : > { %384 = vmatprep.subr.bf16.mxu0 %v934_v13  ;;  %v824_v13 = vpack.c.bf16 %v520_v12, %v519_v11 }
  0x87   : > { %385 = vmatpush1.bf16.msra.mxu0 %v936_v14 }
  0x88   : > { %386 = vmatprep.subr.bf16.mxu0 %v937_v15 }
  0x8b   : > { %387 = vmatpush1.bf16.msra.mxu0 %v939_v16 }
  0x8e   : > { %405 = vmatmul.mubr.bf16.vlgmr.msra.gmra.mrb[0].mxu0 %v940_v17 }
 0x161   : > { %v406_v19 = vpop.f32.mrb[0].mxu0 }
 0x162   : > { %v408_v20 = vpop.f32.mrb[1].mxu0  ;;  %v415_v22 = vmax.f32 %v406_v19, 0.0  ;;  %v608_v19 = vld [vmem:[%s1414_s3] sm:$0x1] }
 0x163   : > { %v410_v21 = vpop.f32.mrb[2].mxu0  ;;  %v416_v27 = vmax.f32 %v408_v20, 0.0 }
 0x164   : > { %v417_v23 = vmax.f32 %v410_v21, 0.0  ;;  %v412_v24 = vpop.f32.mrb[3].mxu0 }
 0x165   : > { %v418_v28 = vmax.f32 %v412_v24, 0.0 }
 0x166   : > { %v792_v29 = vpack.c.bf16 %v417_v23, %v415_v22 }
 0x167   : > { %v790_v30 = vpack.c.bf16 %v418_v28, %v416_v27 }
 0x169   : > { %791 = vmatprep.subr.bf16.mxu1 %v790_v30 }
 0x16a   : > { %793 = vmatpush1.bf16.msra.mxu1 %v792_v29 }
 0x16b   : > { %795 = vmatprep.subr.bf16.mxu1 %v794_v31 }
 0x16d   : > { %750 = vmatmul.mubr.msk.f32.vlgmr.msra.gmra.mrb[0].mxu1 %vm421_vm0, %v1124_v42 }
 0x16e   : > { %797 = vmatpush3.bf16.msra.mxu1 %v796_v36 }
 0x16f   : > { %799 = vmatprep.subr.bf16.mxu1 %v798_v37 }
 0x172   : > { %801 = vmatpush3.bf16.msra.mxu1 %v800_v43 }
 0x173   : > { %803 = vmatprep.subr.bf16.mxu1 %v802_v44 }
 0x176   : > { %805 = vmatpush3.bf16.msra.mxu1 %v804_v49 }
 0x177   : > { %807 = vmatprep.subr.bf16.mxu1 %v806_v50 }
 0x17a   : > { %809 = vmatpush3.bf16.msra.mxu1 %v808_v55 }
 0x17b   : > { %811 = vmatprep.subr.bf16.mxu1 %v810_v56 }
 0x17e   : > { %813 = vmatpush3.bf16.msra.mxu1 %v812_v61 }
 0x17f   : > { %815 = vmatprep.subr.bf16.mxu1 %v814_v62 }
 0x182   : > { %817 = vmatpush3.bf16.msra.mxu1 %v816_v3 }
 0x183   : > { %819 = vmatprep.subr.bf16.mxu1 %v818_v4 }
 0x186   : > { %821 = vmatpush3.bf16.msra.mxu1 %v820_v9 }
 0x187   : > { %823 = vmatprep.subr.bf16.mxu1 %v822_v10 }
 0x18a   : > { %825 = vmatpush3.bf16.msra.mxu1 %v824_v13 }
 0x240   : > { %v491_v14 = vpop.f32.mrb[0].mxu1 }
 0x241   : > { %v493_v15 = vpop.f32.mrb[1].mxu1 }
 0x242   : > { %601 = vmatprep.mubr.f32.mxu1 %v493_v15 }
 0x243   : > { %602 = vmatmul.mubr.f32.vlgmr.msra.gmra.mrb[2].mxu1 %v491_v14 }
 0x316   : > { %v787_v16 = vpop.f32.mrb[2].mxu1 }
 0x317   : > { %v788_v17 = vpop.f32.mrb[3].mxu1 }
 0x318   : > { %v789_v18 = vadd.f32 %v788_v17, %v787_v16 }
 0x31a   : > { %v607_v20 = vmul.f32 0.00390625, %v789_v18 }
 0x31c   : > { %v609_v21 = vadd.f32 %v608_v19, %v607_v20 }
 0x31e   : > { %610 = vst [vmem:[%s259_s12] sm:$0x1] %v609_v21 }
 0x31f   : > { %1040 = shalt.err (!%p1037_p11)
}
 0x320   : > { %s1041_s6 = scalar_lea.hbm %s1362_s11, 16  ;;  %s1045_s9 = scalar_lea.hbm %s1415_s4, 32 }
 0x321   : > { %p1042_p0 = scmp.ne.s32.totalorder %s1362_s11, %s1041_s6  ;;  %p1046_p6 = scmp.lt.u32.totalorder %s1362_s11, %s1415_s4 }
 0x322   : > { %p1047_p7 = scmp.lt.u32.totalorder %s1045_s9, %s1041_s6  ;;  %p1049_p8 = scmp.lt.u32.totalorder %s1041_s6, %s1362_s11 }
 0x323   : > { %p1043_p4 = pnand %p1042_p0, %p1430_p12 }
 0x324   : > { %p1048_p2 = por %p1047_p7, %p1046_p6 }
 0x325   : > { %p1044_p13 = pneg %p1043_p4 }
 0x326   : > { %p1050_p1 = por %p1049_p8, %p1048_p2 }
 0x328   : > { %p1051_p10 = pnand %p1050_p1, %p1044_p13 }
 0x32a   : > { %1054 = shalt.err (!%p1051_p10)
}
 0x32b   : > { %836 = dma.vmem_to_hbm [thread:$0]  (%p1430_p12), %s1364_s13, 16, %s1362_s11, %s612_s24  }
 0x32c PF: > { %s636_s27 = sand.u32 1, %s1093_s15   ;;  %p1431_p3 = scmp.ne.s32.totalorder %s1423_s26, 0 }
 0x32d   : > { %p1432_p5 = scmp.ge.s32.totalorder %s1113_s20, 2  ;;  %s637_s12 = scalar_lea.sflag [#allocation5], %s636_s27 }
 0x32f   : > { %p850_p9 = pnand %p1432_p5, %p1431_p3 }
 0x331   : > { %1088 = dma.done.wait (!%p850_p9), %s637_s12, 16  }
 0x332   : > { %1090 = vsyncadd (!%p850_p9), %s637_s12, 4294967280  ;;  %s21_s20 = sadd.s32 1, %s1113_s20   ;;  %s1433_s15 = smov %s1097_s16 }
 0x333   : > { %p18_p11 = scmp.ge.s32.totalorder %s21_s20, 4   ;;  %s1434_s16 = smov %s1101_s17 }
 0x334   : > { %s1435_s17 = smov %s1293_s22  ;;  %s1436_s18 = smov %s1109_s19 }
 0x335   : > { %s1437_s19 = smov %s1439_s5  ;;  %20 = sbr.rel (!%p18_p11) target bundleno = 7 (0x7), region = 97 }
 0x33c   :  { %641 = vsyncpa [#allocation4], 1 }
 0x33d   :  { %643 = vsyncpa [#allocation4 + $0x1], 1 }
 0x33e   :  { %644 = vsyncpa [#allocation7], 1 }
 0x33f   :  { %645 = vsyncpa [#allocation5], 1 }
 0x340   :  { %647 = vsyncpa [#allocation5 + $0x1], 1 }

</bundles_post_ra>
